<compile_context>
chip_gen: v7x
topology: tpu7x:2x2x1
jax: 0.10.0
libtpu: 0.0.40
codegen_flags: <defaults>
</compile_context>

<pallas_src>
import functools

import jax
import jax.numpy as jnp
from jax import lax
from jax.experimental import pallas as pl
from jax.experimental.pallas import tpu as pltpu


def _flash_attn_residual_kernel(q_ref, k_ref, v_ref, x_ref, gamma_ref, o_ref,
                                m_sc, l_sc, acc_sc):
    """One (batch, query-tile, kv-tile) grid step of online-softmax attention.

    q_ref : (1, TQ,  Cl)  projected queries (matmul dtype)
    k_ref : (1, TKV, Cl)  projected keys    (matmul dtype)
    v_ref : (1, TKV, C)   projected values  (matmul dtype)
    x_ref : (1, TQ,  C)   residual input rows (f32)
    gamma_ref : (1, 1)    SMEM scalar
    o_ref : (1, TQ,  C)   output rows (f32)
    """
    ki = pl.program_id(2)

    # ---- init per (batch, query-tile): reset online-softmax state ----
    @pl.when(ki == 0)
    def _init():
        m_sc[...] = jnp.full_like(m_sc, -jnp.inf)
        l_sc[...] = jnp.zeros_like(l_sc)
        acc_sc[...] = jnp.zeros_like(acc_sc)

    q = q_ref[0]                                                      # (TQ, Cl)
    k = k_ref[0]                                                      # (TKV, Cl)
    v = v_ref[0]                                                      # (TKV, C)

    # ---- energy tile: contract the Cl dims directly (q @ k^T) ----
    s = lax.dot_general(q, k, dimension_numbers=(((1,), (1,)), ((), ())),
                        preferred_element_type=jnp.float32)           # (TQ, TKV)

    # ---- online softmax update (f32 state) ----
    m_prev = m_sc[...]                                                # (TQ, 1)
    m_new = jnp.maximum(m_prev, jnp.max(s, axis=-1, keepdims=True))
    alpha = jnp.exp(m_prev - m_new)
    p = jnp.exp(s - m_new)                                            # (TQ, TKV)
    l_sc[...] = alpha * l_sc[...] + jnp.sum(p, axis=-1, keepdims=True)
    acc_sc[...] = alpha * acc_sc[...] + jnp.dot(
        p.astype(v.dtype), v, preferred_element_type=jnp.float32)     # (TQ, C)
    m_sc[...] = m_new

    # ---- finalize: one exact per-row scale (gamma / l) + fused residual ----
    @pl.when(ki == pl.num_programs(2) - 1)
    def _finalize():
        inv_l = pl.reciprocal(l_sc[...], approx=False)   # once per query tile
        scale = gamma_ref[0, 0] * inv_l                  # (TQ, 1)
        o_ref[0] = (acc_sc[...] * scale + x_ref[0]).astype(o_ref.dtype)


def _pick_tile(n, cap):
    """Largest tile <= cap that divides n and is a multiple of 8, else n."""
    if n <= cap:
        return n
    for t in range(cap, 7, -8):
        if n % t == 0:
            return t
    return n


def self_attn_pallas(x_nchw, params, *, tq=None, tkv=None,
                     matmul_dtype=jnp.bfloat16):
    """SAGAN Self_Attn forward.  x_nchw: (B, C, H, W) f32 -> (B, C, H, W) f32.

    matmul_dtype=bfloat16 (default) feeds the MXU bf16 with f32 accumulation
    and f32 softmax state; pass jnp.float32 for an exact-dtype run.
    """
    B, C, H, W = x_nchw.shape
    N = H * W
    Cl = params["wq"].shape[1]

    # KV tiles fatter than Q tiles: the per-KV-step flash rescale is O(TQ*C),
    # so fewer / larger KV steps amortize it.
    tq = _pick_tile(N, 256) if tq is None else tq
    tkv = _pick_tile(N, 512) if tkv is None else tkv
    assert N % tq == 0 and N % tkv == 0, (N, tq, tkv)

    # NCHW -> (B, N, C) tokens.
    x_tok = jnp.transpose(x_nchw.reshape(B, C, N), (0, 2, 1)).astype(jnp.float32)

    # Hoisted projections: one XLA matmul each, never recomputed per KV step.
    q = (x_tok @ params["wq"] + params["bq"]).astype(matmul_dtype)    # (B, N, Cl)
    k = (x_tok @ params["wk"] + params["bk"]).astype(matmul_dtype)    # (B, N, Cl)
    v = (x_tok @ params["wv"] + params["bv"]).astype(matmul_dtype)    # (B, N, C)
    gamma = params["gamma"].reshape(1, 1).astype(jnp.float32)

    grid = (B, N // tq, N // tkv)

    # VMEM budget: double-buffered q/k/v/x/out blocks + f32 accumulator, with
    # slack.  Capped at 48 MiB so the config also fits v7x (64 MiB physical).
    mmb = jnp.dtype(matmul_dtype).itemsize
    budget = (2 * tq * Cl * mmb + 2 * tkv * Cl * mmb + 2 * tkv * C * mmb
              + 4 * tq * C * 4 + tq * C * 4 + (1 << 20))
    vmem_limit = int(min(48 * 2 ** 20, max(32 * 2 ** 20, 2 * budget)))

    out_tok = pl.pallas_call(
        _flash_attn_residual_kernel,
        out_shape=jax.ShapeDtypeStruct((B, N, C), jnp.float32),
        grid_spec=pltpu.PrefetchScalarGridSpec(
            num_scalar_prefetch=0,
            grid=grid,
            in_specs=[
                pl.BlockSpec((1, tq, Cl), lambda b, qi, ki: (b, qi, 0)),   # q
                pl.BlockSpec((1, tkv, Cl), lambda b, qi, ki: (b, ki, 0)),  # k
                pl.BlockSpec((1, tkv, C), lambda b, qi, ki: (b, ki, 0)),   # v
                pl.BlockSpec((1, tq, C), lambda b, qi, ki: (b, qi, 0)),    # x (residual)
                pl.BlockSpec(memory_space=pltpu.MemorySpace.SMEM),         # gamma
            ],
            out_specs=pl.BlockSpec((1, tq, C), lambda b, qi, ki: (b, qi, 0)),
            scratch_shapes=[
                pltpu.VMEM((tq, 1), jnp.float32),   # running row max m
                pltpu.VMEM((tq, 1), jnp.float32),   # running row sum l
                pltpu.VMEM((tq, C), jnp.float32),   # output accumulator
            ],
        ),
        compiler_params=pltpu.CompilerParams(
            dimension_semantics=("parallel", "parallel", "arbitrary"),
            vmem_limit_bytes=vmem_limit,
        ),
    )(q, k, v, x_tok, gamma)

    # TODO(synk): for C < 128 a lane-dense (1, 1, tq*C) out block would avoid
    # masked vst lanes, but it needs an in-kernel (tq, C)->(tq*C,) relayout and
    # there is only one store per query tile, so it is intentionally left as-is.

    # (B, N, C) -> (B, C, H, W)
    return jnp.transpose(out_tok, (0, 2, 1)).reshape(B, C, H, W)


def _reference(x_nchw, params):
    """Pure-JAX f32 reference mirroring the PyTorch Self_Attn forward."""
    B, C, H, W = x_nchw.shape
    N = H * W
    x_tok = jnp.transpose(x_nchw.reshape(B, C, N), (0, 2, 1))          # (B, N, C)
    q = x_tok @ params["wq"] + params["bq"]                            # (B, N, Cl)
    k = x_tok @ params["wk"] + params["bk"]                            # (B, N, Cl)
    v = x_tok @ params["wv"] + params["bv"]                            # (B, N, C)
    energy = jnp.einsum("bic,bjc->bij", q, k)                          # (B, N, N)
    att = jax.nn.softmax(energy, axis=-1)
    out = jnp.einsum("bij,bjc->bic", att, v)                           # (B, N, C)
    out = params["gamma"].reshape(()) * out + x_tok
    return jnp.transpose(out, (0, 2, 1)).reshape(B, C, H, W)


def init_params(key, in_dim, latent_dim=8):
    cl = in_dim // latent_dim
    ks = jax.random.split(key, 6)
    scale = 1.0 / jnp.sqrt(in_dim)
    return {
        "wq": jax.random.normal(ks[0], (in_dim, cl), jnp.float32) * scale,
        "bq": jax.random.normal(ks[1], (1, cl), jnp.float32) * scale,
        "wk": jax.random.normal(ks[2], (in_dim, cl), jnp.float32) * scale,
        "bk": jax.random.normal(ks[3], (1, cl), jnp.float32) * scale,
        "wv": jax.random.normal(ks[4], (in_dim, in_dim), jnp.float32) * scale,
        "bv": jax.random.normal(ks[5], (1, in_dim), jnp.float32) * scale,
        # PyTorch inits gamma to 0 (out == x); use a nonzero value so the
        # attention path is actually exercised by the checks.
        "gamma": jnp.full((1, 1), 0.5, jnp.float32),
    }


if __name__ == "__main__":
    key = jax.random.PRNGKey(0)
    B, C, H, W = 2, 32, 16, 16        # in_dim=32, latent_dim=8 -> Cl=4, N=256
    kx, kp = jax.random.split(key)
    x = jax.random.normal(kx, (B, C, H, W), jnp.float32)
    params = init_params(kp, C, latent_dim=8)

    ref = _reference(x, params)

    # Explicit small tiles so the flash (query-tile, kv-tile) pipeline is
    # exercised: grid = (B, N//tq, N//tkv) = (2, 4, 2).
    # 1) Exact-dtype path: validates the online-softmax / accumulator math.
    out_f32 = jax.block_until_ready(
        self_attn_pallas(x, params, tq=64, tkv=128, matmul_dtype=jnp.float32))
    assert out_f32.shape == (B, C, H, W)
    err_f32 = float(jnp.max(jnp.abs(out_f32 - ref)))
    assert jnp.allclose(out_f32, ref, atol=2e-4, rtol=2e-4), err_f32

    # 2) Default bf16-MXU path (f32 accumulation / softmax state): looser
    #    tolerance covers the bf16 quantization of q/k/v and p.
    out_bf16 = jax.block_until_ready(
        self_attn_pallas(x, params, tq=64, tkv=128))
    err_bf16 = float(jnp.max(jnp.abs(out_bf16 - ref)))
    assert jnp.allclose(out_bf16, ref, atol=6e-2, rtol=6e-2), err_bf16

    print("KERNEL_OK")
</pallas_src>

<mosaic_0001>
module attributes {stable_mosaic.version = 11 : i64} {
  func.func @_flash_attn_residual_kernel(%arg0: i32, %arg1: i32, %arg2: i32, %arg3: memref<1x64x4xf32, #tpu.memory_space<vmem>>, %arg4: memref<1x128x4xf32, #tpu.memory_space<vmem>>, %arg5: memref<1x128x32xf32, #tpu.memory_space<vmem>>, %arg6: memref<1x64x32xf32, #tpu.memory_space<vmem>>, %arg7: memref<1x1xf32, #tpu.memory_space<smem>>, %arg8: memref<1x64x32xf32, #tpu.memory_space<vmem>>, %arg9: memref<64x1xf32, #tpu.memory_space<vmem>>, %arg10: memref<64x1xf32, #tpu.memory_space<vmem>>, %arg11: memref<64x32xf32, #tpu.memory_space<vmem>>) attributes {dimension_semantics = [#tpu.dimension_semantics<parallel>, #tpu.dimension_semantics<parallel>, #tpu.dimension_semantics<arbitrary>], iteration_bounds = array<i64: 2, 4, 2>, scalar_prefetch = 0 : i64, scratch_operands = 3 : i64, tpu.core_type = #tpu.core_type<tc>, window_params = [{transform_indices = @transform_0, window_bounds = array<i64: 1, 64, 4>}, {transform_indices = @transform_1, window_bounds = array<i64: 1, 128, 4>}, {transform_indices = @transform_2, window_bounds = array<i64: 1, 128, 32>}, {transform_indices = @transform_3, window_bounds = array<i64: 1, 64, 32>}, {transform_indices = @transform_4, window_bounds = array<i64: 1, 1>}, {transform_indices = @transform_5, window_bounds = array<i64: 1, 64, 32>}]} {
    %c0_i32 = arith.constant 0 : i32
    %0 = arith.cmpi eq, %arg2, %c0_i32 : i32
    %1 = arith.extui %0 : i1 to i32
    %c0_i32_0 = arith.constant 0 : i32
    %2 = arith.cmpi ne, %1, %c0_i32_0 : i32
    scf.if %2 {
      %cst_25 = arith.constant 0xFF800000 : f32
      %35 = vector.broadcast %cst_25 : f32 to vector<64x1xf32>
      %c0_26 = arith.constant 0 : index
      %c0_27 = arith.constant 0 : index
      %36 = vector.load %arg9[%c0_26, %c0_27] : memref<64x1xf32, #tpu.memory_space<vmem>>, vector<64x1xf32>
      tpu.vector_store %arg9[%c0_26, %c0_27], %35 {strides = array<i32>} : memref<64x1xf32, #tpu.memory_space<vmem>>, vector<64x1xf32>,
      %cst_28 = arith.constant 0.000000e+00 : f32
      %37 = vector.broadcast %cst_28 : f32 to vector<64x1xf32>
      %c0_29 = arith.constant 0 : index
      %c0_30 = arith.constant 0 : index
      %38 = vector.load %arg10[%c0_29, %c0_30] : memref<64x1xf32, #tpu.memory_space<vmem>>, vector<64x1xf32>
      tpu.vector_store %arg10[%c0_29, %c0_30], %37 {strides = array<i32>} : memref<64x1xf32, #tpu.memory_space<vmem>>, vector<64x1xf32>,
      %cst_31 = arith.constant 0.000000e+00 : f32
      %39 = vector.broadcast %cst_31 : f32 to vector<64x32xf32>
      %c0_32 = arith.constant 0 : index
      %c0_33 = arith.constant 0 : index
      %40 = vector.load %arg11[%c0_32, %c0_33] : memref<64x32xf32, #tpu.memory_space<vmem>>, vector<64x32xf32>
      tpu.vector_store %arg11[%c0_32, %c0_33], %39 {strides = array<i32>} : memref<64x32xf32, #tpu.memory_space<vmem>>, vector<64x32xf32>,
    } else {
    }
    %c0 = arith.constant 0 : index
    %c0_1 = arith.constant 0 : index
    %c0_2 = arith.constant 0 : index
    %3 = vector.load %arg3[%c0, %c0_1, %c0_2] : memref<1x64x4xf32, #tpu.memory_space<vmem>>, vector<1x64x4xf32>
    %4 = vector.shape_cast %3 : vector<1x64x4xf32> to vector<64x4xf32>
    %c0_3 = arith.constant 0 : index
    %c0_4 = arith.constant 0 : index
    %c0_5 = arith.constant 0 : index
    %5 = vector.load %arg4[%c0_3, %c0_4, %c0_5] : memref<1x128x4xf32, #tpu.memory_space<vmem>>, vector<1x128x4xf32>
    %6 = vector.shape_cast %5 : vector<1x128x4xf32> to vector<128x4xf32>
    %c0_6 = arith.constant 0 : index
    %c0_7 = arith.constant 0 : index
    %c0_8 = arith.constant 0 : index
    %7 = vector.load %arg5[%c0_6, %c0_7, %c0_8] : memref<1x128x32xf32, #tpu.memory_space<vmem>>, vector<1x128x32xf32>
    %8 = vector.shape_cast %7 : vector<1x128x32xf32> to vector<128x32xf32>
    %cst = arith.constant dense<0.000000e+00> : vector<64x128xf32>
    %9 = tpu.matmul %4, %6, %cst {dimension_numbers = #tpu.dot_dimension_numbers<[1], [1], [0], [0], [0, 0, 1, 0], [], []>} : vector<64x4xf32>, vector<128x4xf32>, vector<64x128xf32> -> vector<64x128xf32>
    %c0_9 = arith.constant 0 : index
    %c0_10 = arith.constant 0 : index
    %10 = vector.load %arg9[%c0_9, %c0_10] : memref<64x1xf32, #tpu.memory_space<vmem>>, vector<64x1xf32>
    %cst_11 = arith.constant dense<0xFF800000> : vector<64xf32>
    %11 = vector.multi_reduction <maximumf>, %9, %cst_11 [1] : vector<64x128xf32> to vector<64xf32>
    %12 = vector.shape_cast %11 : vector<64xf32> to vector<64x1xf32>
    %13 = arith.maximumf %10, %12 : vector<64x1xf32>
    %14 = arith.subf %10, %13 : vector<64x1xf32>
    %15 = math.exp %14 : vector<64x1xf32>
    %16 = vector.broadcast %13 : vector<64x1xf32> to vector<64x128xf32>
    %17 = arith.subf %9, %16 : vector<64x128xf32>
    %18 = math.exp %17 : vector<64x128xf32>
    %c0_12 = arith.constant 0 : index
    %c0_13 = arith.constant 0 : index
    %19 = vector.load %arg10[%c0_12, %c0_13] : memref<64x1xf32, #tpu.memory_space<vmem>>, vector<64x1xf32>
    %20 = arith.mulf %15, %19 : vector<64x1xf32>
    %cst_14 = arith.constant dense<0.000000e+00> : vector<64xf32>
    %21 = vector.multi_reduction <add>, %18, %cst_14 [1] : vector<64x128xf32> to vector<64xf32>
    %22 = vector.shape_cast %21 : vector<64xf32> to vector<64x1xf32>
    %23 = arith.addf %20, %22 : vector<64x1xf32>
    %c0_15 = arith.constant 0 : index
    %c0_16 = arith.constant 0 : index
    %24 = vector.load %arg10[%c0_15, %c0_16] : memref<64x1xf32, #tpu.memory_space<vmem>>, vector<64x1xf32>
    tpu.vector_store %arg10[%c0_15, %c0_16], %23 {strides = array<i32>} : memref<64x1xf32, #tpu.memory_space<vmem>>, vector<64x1xf32>,
    %c0_17 = arith.constant 0 : index
    %c0_18 = arith.constant 0 : index
    %25 = vector.load %arg11[%c0_17, %c0_18] : memref<64x32xf32, #tpu.memory_space<vmem>>, vector<64x32xf32>
    %26 = vector.broadcast %15 : vector<64x1xf32> to vector<64x32xf32>
    %27 = arith.mulf %26, %25 : vector<64x32xf32>
    %cst_19 = arith.constant dense<0.000000e+00> : vector<64x32xf32>
    %28 = tpu.matmul %18, %8, %cst_19 {dimension_numbers = #tpu.dot_dimension_numbers<[1], [0], [0], [1], [0, 0, 1, 1], [], []>} : vector<64x128xf32>, vector<128x32xf32>, vector<64x32xf32> -> vector<64x32xf32>
    %29 = arith.addf %27, %28 : vector<64x32xf32>
    %c0_20 = arith.constant 0 : index
    %c0_21 = arith.constant 0 : index
    %30 = vector.load %arg11[%c0_20, %c0_21] : memref<64x32xf32, #tpu.memory_space<vmem>>, vector<64x32xf32>
    tpu.vector_store %arg11[%c0_20, %c0_21], %29 {strides = array<i32>} : memref<64x32xf32, #tpu.memory_space<vmem>>, vector<64x32xf32>,
    %c0_22 = arith.constant 0 : index
    %c0_23 = arith.constant 0 : index
    %31 = vector.load %arg9[%c0_22, %c0_23] : memref<64x1xf32, #tpu.memory_space<vmem>>, vector<64x1xf32>
    tpu.vector_store %arg9[%c0_22, %c0_23], %13 {strides = array<i32>} : memref<64x1xf32, #tpu.memory_space<vmem>>, vector<64x1xf32>,
    %c1_i32 = arith.constant 1 : i32
    %32 = arith.cmpi eq, %arg2, %c1_i32 : i32
    %33 = arith.extui %32 : i1 to i32
    %c0_i32_24 = arith.constant 0 : i32
    %34 = arith.cmpi ne, %33, %c0_i32_24 : i32
    scf.if %34 {
      %c0_25 = arith.constant 0 : index
      %c0_26 = arith.constant 0 : index
      %35 = vector.load %arg10[%c0_25, %c0_26] : memref<64x1xf32, #tpu.memory_space<vmem>>, vector<64x1xf32>
      %36 = tpu.reciprocal %35 : vector<64x1xf32> -> vector<64x1xf32>
      %c0_27 = arith.constant 0 : index
      %c0_28 = arith.constant 0 : index
      %37 = memref.load %arg7[%c0_27, %c0_28] : memref<1x1xf32, #tpu.memory_space<smem>>
      %38 = vector.broadcast %37 : f32 to vector<64x1xf32>
      %39 = arith.mulf %38, %36 : vector<64x1xf32>
      %c0_29 = arith.constant 0 : index
      %c0_30 = arith.constant 0 : index
      %40 = vector.load %arg11[%c0_29, %c0_30] : memref<64x32xf32, #tpu.memory_space<vmem>>, vector<64x32xf32>
      %41 = vector.broadcast %39 : vector<64x1xf32> to vector<64x32xf32>
      %42 = arith.mulf %40, %41 : vector<64x32xf32>
      %c0_31 = arith.constant 0 : index
      %c0_32 = arith.constant 0 : index
      %c0_33 = arith.constant 0 : index
      %43 = vector.load %arg6[%c0_31, %c0_32, %c0_33] : memref<1x64x32xf32, #tpu.memory_space<vmem>>, vector<1x64x32xf32>
      %44 = vector.shape_cast %43 : vector<1x64x32xf32> to vector<64x32xf32>
      %45 = arith.addf %42, %44 : vector<64x32xf32>
      %c0_34 = arith.constant 0 : index
      %c0_35 = arith.constant 0 : index
      %c0_36 = arith.constant 0 : index
      %46 = vector.load %arg8[%c0_34, %c0_35, %c0_36] : memref<1x64x32xf32, #tpu.memory_space<vmem>>, vector<1x64x32xf32>
      %47 = vector.shape_cast %46 : vector<1x64x32xf32> to vector<64x32xf32>
      %48 = vector.shape_cast %45 : vector<64x32xf32> to vector<1x64x32xf32>
      tpu.vector_store %arg8[%c0_34, %c0_35, %c0_36], %48 {strides = array<i32>} : memref<1x64x32xf32, #tpu.memory_space<vmem>>, vector<1x64x32xf32>,
    } else {
    }
    return
  }
  func.func @transform_0(%arg0: i32, %arg1: i32, %arg2: i32) -> (i32, i32, i32) {
    %c0_i32 = arith.constant 0 : i32
    %c0_i32_0 = arith.constant 0 : i32
    return %arg0, %arg1, %c0_i32 : i32, i32, i32
  }
  func.func @transform_1(%arg0: i32, %arg1: i32, %arg2: i32) -> (i32, i32, i32) {
    %c0_i32 = arith.constant 0 : i32
    %c0_i32_0 = arith.constant 0 : i32
    return %arg0, %arg2, %c0_i32 : i32, i32, i32
  }
  func.func @transform_2(%arg0: i32, %arg1: i32, %arg2: i32) -> (i32, i32, i32) {
    %c0_i32 = arith.constant 0 : i32
    %c0_i32_0 = arith.constant 0 : i32
    return %arg0, %arg2, %c0_i32 : i32, i32, i32
  }
  func.func @transform_3(%arg0: i32, %arg1: i32, %arg2: i32) -> (i32, i32, i32) {
    %c0_i32 = arith.constant 0 : i32
    %c0_i32_0 = arith.constant 0 : i32
    return %arg0, %arg1, %c0_i32 : i32, i32, i32
  }
  func.func @transform_4(%arg0: i32, %arg1: i32, %arg2: i32) -> (i32, i32) {
    %c0_i32 = arith.constant 0 : i32
    %c0_i32_0 = arith.constant 0 : i32
    %c0_i32_1 = arith.constant 0 : i32
    return %c0_i32, %c0_i32_0 : i32, i32
  }
  func.func @transform_5(%arg0: i32, %arg1: i32, %arg2: i32) -> (i32, i32, i32) {
    %c0_i32 = arith.constant 0 : i32
    %c0_i32_0 = arith.constant 0 : i32
    return %arg0, %arg1, %c0_i32 : i32, i32, i32
  }
}

</mosaic_0001>

<bundles_post_ra>
// kernel: tpu_custom_call.1
= control target key start
LH: loop header
LB: loop body
LE: loop exit
PB: predicated region body
PF: predicated region fallthrough
CT: control target
= control target key end

     0   :  { %s1712_s20 = smov 0   ;;  %s1714_s21 = smov 0   ;;  %s2058_s0 = inlined_call_operand.vmem [shape: f32[2,256,4], index: 0, kind: input, shape index: {}]   ;;  %s2059_s1 = inlined_call_operand.vmem [shape: f32[2,256,4], index: 1, kind: input, shape index: {}]   ;;  %s2060_s2 = inlined_call_operand.vmem [shape: f32[2,256,32], index: 2, kind: input, shape index: {}]   ;;  %s2061_s3 = inlined_call_operand.vmem [shape: f32[2,256,32], index: 3, kind: input, shape index: {}]   ;;  %s2062_s4 = inlined_call_operand.<no memory space> [shape: f32[1,1], index: 4, kind: input, shape index: {}]   ;;  %s2063_s5 = inlined_call_operand.vmem [shape: f32[2,256,32], index: 5, kind: output, shape index: {}]  }
   0x1   :  { %10 = sst [smem:[#allocation5]] %s2062_s4  ;;  %s1716_s22 = smov 0  }
   0x2   :  { %s1718_s23 = smov 0   ;;  %s1720_s24 = smov 0  }
   0x3   :  { %s1722_s25 = smov 0   ;;  %s1724_s26 = smov 0  }
   0x4 LB: > { %s28_s4 = sadd.s32 1, %s1661_s23  ;;  %s31_s27 = sadd.s32 1, %s1665_s24  ;;  %s1673_s26 = sphi %s1724_s26, %s16_s26   ;;  %s1669_s25 = sphi %s1722_s25, %s2071_s25   ;;  %s1665_s24 = sphi %s1720_s24, %s2070_s24   ;;  %s1661_s23 = sphi %s1718_s23, %s2069_s23   ;;  %s1657_s22 = sphi %s1716_s22, %s2068_s22   ;;  %s1653_s21 = sphi %s1714_s21, %s2067_s21   ;;  %s1649_s20 = sphi %s1712_s20, %s2066_s20  }
   0x5   : > { %p29_p0 = scmp.ge.s32.totalorder %s28_s4, 2  ;;  %p1247_p1 = scmp.ge.s32.totalorder %s1673_s26, 1 }
   0x6   : > { %p267_p2 = scmp.lt.s32.totalorder %s1673_s26, 17  ;;  %s35_s28 = sadd.s32 1, %s1669_s25 }
   0x7   : > { %s2073_s4 = smov (%p29_p0, %s28_s4), 0  ;;  %s2075_s27 = smov (!%p29_p0, %s31_s27), %s1665_s24 }
   0x8   : > { %p268_p3 = pnand %p1247_p1, %p267_p2  ;;  %p33_p4 = scmp.ge.s32.totalorder %s2075_s27, 4 }
   0x9   : > { %s1248_s29 = sshll.u32 (!%p268_p3), %s1653_s21, 3  ;;  %p331_p6 = scmp.lt.s32.totalorder (!%p268_p3), %s1657_s22, 1 }
   0xa   : > { %s2077_s27 = smov (%p33_p4, %s2075_s27), 0  ;;  %s2079_s28 = smov (!%p33_p4, %s35_s28), %s1669_s25 }
   0xb   : > { %p37_p5 = scmp.ge.s32.totalorder %s2079_s28, 2  ;;  %271 = sbr.rel (%p268_p3) target bundleno = 926 (0x39e), region = 40 }
   0xc   : > { %p333_p7 = scmp.lt.s32.totalorder (!%p268_p3), %s1248_s29, 31  ;;  %s1251_s30 = sshll.u32 (!%p268_p3), %s1649_s20, 4 }
   0xd   : > { %s2081_s28 = smov (%p37_p5, %s2079_s28), 0  ;;  %p343_p8 = scmp.lt.s32.totalorder (!%p268_p3), %s1251_s30, 31 }
   0xe   : > { %p1263_p9 = scmp.ne.s32.totalorder (!%p268_p3), %s1649_s20, 0 }
  0x12   : > { %s2083_s22 = smov (!%p331_p6, %s1657_s22), 1  ;;  %s2085_s29 = smov (!%p333_p7, %s1248_s29), 31 }
  0x13   : > { %s1249_s6 = sshll.u32 %s2083_s22, 5  ;;  %s2087_s30 = smov (!%p343_p8, %s1251_s30), 31  ;;  %vm384_vm0 = vcmask (!%p1263_p9), 7168   ;;  %vm401_vm1 = vcmask (!%p1263_p9), 261120   ;;  %v1675_v0 = vmov (!%p1263_p9), -inf   ;;  %v1676_v1 = vmov (!%p1263_p9), 0.0  }
  0x14   : > { %s336_s7 = sadd.s32 %s1249_s6, %s2085_s29  ;;  %s346_s18 = sadd.s32 %s1249_s6, %s2087_s30  ;;  %385 = vst.msk [vmem:[#allocation2] sm:$0xff] (!%p1263_p9), %vm384_vm0, %v1675_v0  ;;  %386 = vst.msk [vmem:[#allocation2 + $0x8] sm:$0xff] (!%p1263_p9), %vm384_vm0, %v1675_v0 }
  0x15   : > { %s1250_s8 = sshll.u32 %s336_s7, 3  ;;  %s1253_s19 = sshll.u32 %s346_s18, 3  ;;  %387 = vst.msk [vmem:[#allocation2 + $0x10] sm:$0xff] (!%p1263_p9), %vm384_vm0, %v1675_v0  ;;  %388 = vst.msk [vmem:[#allocation2 + $0x18] sm:$0xff] (!%p1263_p9), %vm384_vm0, %v1675_v0 }
  0x16   : > { %s1760_s11 = scalar_lea.vmem %s2058_s0, %s1250_s8  ;;  %s1765_s14 = scalar_lea.vmem %s2061_s3, %s1250_s8  ;;  %389 = vst.msk [vmem:[#allocation2 + $0x20] sm:$0xff] (!%p1263_p9), %vm384_vm0, %v1675_v0  ;;  %390 = vst.msk [vmem:[#allocation2 + $0x28] sm:$0xff] (!%p1263_p9), %vm384_vm0, %v1675_v0 }
  0x17   : > { %s1770_s17 = scalar_lea.vmem %s2063_s5, %s1250_s8  ;;  %s1775_s29 = scalar_lea.vmem %s2059_s1, %s1253_s19  ;;  %391 = vst.msk [vmem:[#allocation2 + $0x30] sm:$0xff] (!%p1263_p9), %vm384_vm0, %v1675_v0  ;;  %392 = vst.msk [vmem:[#allocation2 + $0x38] sm:$0xff] (!%p1263_p9), %vm384_vm0, %v1675_v0 }
  0x18   : > { %s1780_s10 = scalar_lea.vmem %s2060_s2, %s1253_s19  ;;  %383 = sbr.rel (%p1263_p9) target bundleno = 32 (0x20), region = 44  ;;  %393 = vst.msk [vmem:[#allocation3] sm:$0xff] (!%p1263_p9), %vm384_vm0, %v1676_v1  ;;  %394 = vst.msk [vmem:[#allocation3 + $0x8] sm:$0xff] (!%p1263_p9), %vm384_vm0, %v1676_v1 }
  0x19   : > { %395 = vst.msk [vmem:[#allocation3 + $0x10] sm:$0xff] (!%p1263_p9), %vm384_vm0, %v1676_v1  ;;  %396 = vst.msk [vmem:[#allocation3 + $0x18] sm:$0xff] (!%p1263_p9), %vm384_vm0, %v1676_v1 }
  0x1a   : > { %397 = vst.msk [vmem:[#allocation3 + $0x20] sm:$0xff] (!%p1263_p9), %vm384_vm0, %v1676_v1  ;;  %398 = vst.msk [vmem:[#allocation3 + $0x28] sm:$0xff] (!%p1263_p9), %vm384_vm0, %v1676_v1 }
  0x1b   : > { %399 = vst.msk [vmem:[#allocation3 + $0x30] sm:$0xff] (!%p1263_p9), %vm384_vm0, %v1676_v1  ;;  %400 = vst.msk [vmem:[#allocation3 + $0x38] sm:$0xff] (!%p1263_p9), %vm384_vm0, %v1676_v1 }
  0x1c   : > { %402 = vst.msk [vmem:[#allocation4] sm:$0xff] (!%p1263_p9), %vm401_vm1, %v1676_v1  ;;  %403 = vst.msk [vmem:[#allocation4 + $0x8] sm:$0xff] (!%p1263_p9), %vm401_vm1, %v1676_v1 }
  0x1d   : > { %404 = vst.msk [vmem:[#allocation4 + $0x10] sm:$0xff] (!%p1263_p9), %vm401_vm1, %v1676_v1  ;;  %405 = vst.msk [vmem:[#allocation4 + $0x18] sm:$0xff] (!%p1263_p9), %vm401_vm1, %v1676_v1 }
  0x1e   : > { %406 = vst.msk [vmem:[#allocation4 + $0x20] sm:$0xff] (!%p1263_p9), %vm401_vm1, %v1676_v1  ;;  %407 = vst.msk [vmem:[#allocation4 + $0x28] sm:$0xff] (!%p1263_p9), %vm401_vm1, %v1676_v1 }
  0x1f   : > { %408 = vst.msk [vmem:[#allocation4 + $0x30] sm:$0xff] %vm401_vm1, %v1676_v1  ;;  %409 = vst.msk [vmem:[#allocation4 + $0x38] sm:$0xff] %vm401_vm1, %v1676_v1 }
  0x20 PF: > { %v418_v2 = vld [vmem:[%s1775_s29] sm:$0xff]  ;;  %v419_v3 = vld [vmem:[%s1775_s29 + $0x8] sm:$0xff]  ;;  %vm450_vm2 = vcmask 31744   ;;  %v420_v4 = vld [vmem:[%s1775_s29 + $0x10] sm:$0xff]  ;;  %v1677_v43 = vmov 0   ;;  %vm788_vm4 = vcmask 7168  }
  0x21   : > { %v1427_v5 = vpack.c.bf16 %v419_v3, %v418_v2  ;;  %vm1812_vm3 = vmpackc.low %vm450_vm2, %vm450_vm2  ;;  %v421_v7 = vld [vmem:[%s1775_s29 + $0x18] sm:$0xff]  ;;  %v410_v9 = vld [vmem:[%s1760_s11] sm:$0xff]  ;;  %1567 = vset.pattern.permute.xlu0 %v1677_v43  ;;  %1568 = vset.pattern.permute.xlu1 %v1677_v43  ;;  %vm966_vm5 = vcmask 261120   ;;  %p1288_p10 = scmp.ne.s32.totalorder %s1649_s20, 1 }
  0x22   : > { %v1433_v8 = vpack.c.bf16 %v421_v7, %v420_v4  ;;  %v422_v10 = vld [vmem:[%s1775_s29 + $0x20] sm:$0xff]  ;;  %v423_v11 = vld [vmem:[%s1775_s29 + $0x28] sm:$0xff]  ;;  %1371 = vmatprep.mubr.msk.f32.mxu0 %vm450_vm2, %v410_v9  ;;  %v424_v13 = vld [vmem:[%s1775_s29 + $0x30] sm:$0xff]  ;;  %s1003_s30 = sld [smem:[#allocation5]] (!%p1288_p10) }
  0x23   : > { %1429 = vmatprep.subr.msk.bf16.mxu0 %vm1812_vm3, %v1427_v5  ;;  %v1439_v12 = vpack.c.bf16 %v423_v11, %v422_v10  ;;  %v425_v14 = vld [vmem:[%s1775_s29 + $0x38] sm:$0xff]  ;;  %v426_v16 = vld [vmem:[%s1775_s29 + $0x40] sm:$0xff]  ;;  %v427_v17 = vld [vmem:[%s1775_s29 + $0x48] sm:$0xff] }
  0x24   : > { %1432 = vmatpush3.bf16.xpose.msk.msra.mxu0 %vm1812_vm3, %v1427_v5  ;;  %v1445_v15 = vpack.c.bf16 %v425_v14, %v424_v13  ;;  %v1451_v18 = vpack.c.bf16 %v427_v17, %v426_v16  ;;  %v428_v19 = vld [vmem:[%s1775_s29 + $0x50] sm:$0xff]  ;;  %v429_v20 = vld [vmem:[%s1775_s29 + $0x58] sm:$0xff]  ;;  %v430_v22 = vld [vmem:[%s1775_s29 + $0x60] sm:$0xff] }
  0x25   : > { %1435 = vmatprep.subr.msk.bf16.mxu0 %vm1812_vm3, %v1433_v8  ;;  %v1457_v21 = vpack.c.bf16 %v429_v20, %v428_v19  ;;  %v431_v23 = vld [vmem:[%s1775_s29 + $0x68] sm:$0xff]  ;;  %v432_v25 = vld [vmem:[%s1775_s29 + $0x70] sm:$0xff]  ;;  %v433_v26 = vld [vmem:[%s1775_s29 + $0x78] sm:$0xff] }
  0x26   : > { %v1463_v24 = vpack.c.bf16 %v431_v23, %v430_v22  ;;  %v1469_v27 = vpack.c.bf16 %v433_v26, %v432_v25  ;;  %v411_v28 = vld [vmem:[%s1760_s11 + $0x8] sm:$0xff]  ;;  %v412_v29 = vld [vmem:[%s1760_s11 + $0x10] sm:$0xff]  ;;  %v413_v30 = vld [vmem:[%s1760_s11 + $0x18] sm:$0xff] }
  0x27   : > { %v414_v31 = vld [vmem:[%s1760_s11 + $0x20] sm:$0xff]  ;;  %v415_v32 = vld [vmem:[%s1760_s11 + $0x28] sm:$0xff]  ;;  %v416_v33 = vld [vmem:[%s1760_s11 + $0x30] sm:$0xff] }
  0x28   : > { %v417_v34 = vld [vmem:[%s1760_s11 + $0x38] sm:$0xff]  ;;  %v434_v44 = vld [vmem:[%s1780_s10] sm:$0xff]  ;;  %v435_v45 = vld [vmem:[%s1780_s10 + $0x8] sm:$0xff] }
  0x29   : > { %v436_v46 = vld [vmem:[%s1780_s10 + $0x10] sm:$0xff]  ;;  %v1475_v47 = vpack.c.bf16 %v435_v45, %v434_v44  ;;  %v437_v48 = vld [vmem:[%s1780_s10 + $0x18] sm:$0xff]  ;;  %v438_v50 = vld [vmem:[%s1780_s10 + $0x20] sm:$0xff] }
  0x2a   : > { %v1479_v49 = vpack.c.bf16 %v437_v48, %v436_v46  ;;  %v439_v51 = vld [vmem:[%s1780_s10 + $0x28] sm:$0xff]  ;;  %v440_v53 = vld [vmem:[%s1780_s10 + $0x30] sm:$0xff]  ;;  %v441_v54 = vld [vmem:[%s1780_s10 + $0x38] sm:$0xff] }
  0x2b   : > { %1476 = vmatprep.subr.bf16.mxu1 %v1475_v47  ;;  %v1483_v52 = vpack.c.bf16 %v439_v51, %v438_v50  ;;  %v1487_v55 = vpack.c.bf16 %v441_v54, %v440_v53  ;;  %v628_v56 = vld [vmem:[#allocation2] sm:$0xff]  ;;  %v1909_v59 = vld [vmem:[#allocation2 + $0x8] sm:$0xff]  ;;  %v1911_v60 = vld [vmem:[#allocation2 + $0x10] sm:$0xff] }
  0x2c   : > { %1438 = vmatpush3.bf16.xpose.msk.msra.mxu0 %vm1812_vm3, %v1433_v8  ;;  %1478 = vmatpush3.bf16.msra.mxu1 %v1475_v47  ;;  %v442_v0 = vld [vmem:[%s1780_s10 + $0x40] sm:$0xff]  ;;  %v443_v1 = vld [vmem:[%s1780_s10 + $0x48] sm:$0xff]  ;;  %v631_v6 = vld [vmem:[#allocation2 + $0x18] sm:$0xff] }
  0x2d   : > { %1441 = vmatprep.subr.msk.bf16.mxu0 %vm1812_vm3, %v1439_v12  ;;  %1480 = vmatprep.subr.bf16.mxu1 %v1479_v49  ;;  %v1491_v5 = vpack.c.bf16 %v443_v1, %v442_v0  ;;  %v1918_v7 = vld [vmem:[#allocation2 + $0x20] sm:$0xff]  ;;  %v444_v10 = vld [vmem:[%s1780_s10 + $0x50] sm:$0xff]  ;;  %v445_v11 = vld [vmem:[%s1780_s10 + $0x58] sm:$0xff] }
  0x2e   : > { %v633_v14 = vld [vmem:[#allocation2 + $0x28] sm:$0xff]  ;;  %v1495_v16 = vpack.c.bf16 %v445_v11, %v444_v10  ;;  %v446_v20 = vld [vmem:[%s1780_s10 + $0x60] sm:$0xff]  ;;  %v1934_v25 = vld [vmem:[#allocation2 + $0x38] sm:$0xff] }
  0x30   : > { %1482 = vmatpush3.bf16.msra.mxu1 %v1479_v49 }
  0x31   : > { %1484 = vmatprep.subr.bf16.mxu1 %v1483_v52 }
  0x34   : > { %1444 = vmatpush3.bf16.xpose.msk.msra.mxu0 %vm1812_vm3, %v1439_v12  ;;  %1486 = vmatpush3.bf16.msra.mxu1 %v1483_v52 }
  0x35   : > { %1447 = vmatprep.subr.msk.bf16.mxu0 %vm1812_vm3, %v1445_v15  ;;  %1488 = vmatprep.subr.bf16.mxu1 %v1487_v55 }
  0x38   : > { %1490 = vmatpush3.bf16.msra.mxu1 %v1487_v55 }
  0x39   : > { %1492 = vmatprep.subr.bf16.mxu1 %v1491_v5 }
  0x3c   : > { %1450 = vmatpush3.bf16.xpose.msk.msra.mxu0 %vm1812_vm3, %v1445_v15  ;;  %1494 = vmatpush3.bf16.msra.mxu1 %v1491_v5  ;;  %v1925_v15 = vld [vmem:[#allocation2 + $0x30] sm:$0xff] }
  0x3d   : > { %1453 = vmatprep.subr.msk.bf16.mxu0 %vm1812_vm3, %v1451_v18  ;;  %1496 = vmatprep.subr.bf16.mxu1 %v1495_v16 }
  0x40   : > { %1498 = vmatpush3.bf16.msra.mxu1 %v1495_v16 }
  0x44   : > { %1456 = vmatpush3.bf16.xpose.msk.msra.mxu0 %vm1812_vm3, %v1451_v18 }
  0x45   : > { %1459 = vmatprep.subr.msk.bf16.mxu0 %vm1812_vm3, %v1457_v21 }
  0x4c   : > { %1462 = vmatpush3.bf16.xpose.msk.msra.mxu0 %vm1812_vm3, %v1457_v21  ;;  %v447_v21 = vld [vmem:[%s1780_s10 + $0x68] sm:$0xff] }
  0x4d   : > { %1465 = vmatprep.subr.msk.bf16.mxu0 %vm1812_vm3, %v1463_v24  ;;  %v1499_v26 = vpack.c.bf16 %v447_v21, %v446_v20 }
  0x4f   : > { %1500 = vmatprep.subr.bf16.mxu1 %v1499_v26 }
  0x50   : > { %1502 = vmatpush3.bf16.msra.mxu1 %v1499_v26 }
  0x54   : > { %1468 = vmatpush3.bf16.xpose.msk.msra.mxu0 %vm1812_vm3, %v1463_v24 }
  0x55   : > { %1471 = vmatprep.subr.msk.bf16.mxu0 %vm1812_vm3, %v1469_v27 }
  0x5c   : > { %1474 = vmatpush3.bf16.xpose.msk.msra.mxu0 %vm1812_vm3, %v1469_v27 }
  0x63   : > { %1372 = vmatmul.mubr.msk.f32.vlgmr.msra.gmra.mrb[0].mxu0 %vm450_vm2, %v411_v28 }
  0x64   : > { %1374 = vmatprep.mubr.msk.f32.mxu0 %vm450_vm2, %v412_v29 }
  0x67   : > { %1375 = vmatmul.mubr.msk.f32.gmra.mrb[2].mxu0 %vm450_vm2, %v413_v30 }
  0x68   : > { %1377 = vmatprep.mubr.msk.f32.mxu0 %vm450_vm2, %v414_v31  ;;  %v448_v31 = vld [vmem:[%s1780_s10 + $0x70] sm:$0xff] }
  0x6b   : > { %1378 = vmatmul.mubr.msk.f32.gmra.mrb[4].mxu0 %vm450_vm2, %v415_v32  ;;  %v449_v32 = vld [vmem:[%s1780_s10 + $0x78] sm:$0xff] }
  0x6c   : > { %1380 = vmatprep.mubr.msk.f32.mxu0 %vm450_vm2, %v416_v33  ;;  %v1503_v44 = vpack.c.bf16 %v449_v32, %v448_v31 }
  0x6e   : > { %1504 = vmatprep.subr.bf16.mxu1 %v1503_v44 }
  0x6f   : > { %1381 = vmatmul.mubr.msk.f32.gmra.mrb[6].mxu0 %vm450_vm2, %v417_v34  ;;  %1506 = vmatpush3.bf16.msra.mxu1 %v1503_v44 }
 0x136   : > { %v1877_v35 = vpop.f32.mrb[0].mxu0 }
 0x137   : > { %v1879_v36 = vpop.f32.mrb[1].mxu0 }
 0x138   : > { %636 = vmax.xlane.f32.xlu0 %v1879_v36 }
 0x13a   : > { %v1882_v37 = vpop.f32.mrb[2].mxu0 }
 0x13b   : > { %v1884_v38 = vpop.f32.mrb[3].mxu0 }
 0x13c   : > { %638 = vmax.xlane.f32.xlu0 %v1877_v35  ;;  %640 = vmax.xlane.f32.xlu1 %v1884_v38 }
 0x13e   : > { %v1888_v39 = vpop.f32.mrb[4].mxu0 }
 0x13f   : > { %v1890_v40 = vpop.f32.mrb[5].mxu0 }
 0x140   : > { %642 = vmax.xlane.f32.xlu1 %v1882_v37  ;;  %644 = vmax.xlane.f32.xlu0 %v1890_v40 }
 0x142   : > { %v1894_v41 = vpop.f32.mrb[6].mxu0 }
 0x143   : > { %v1896_v42 = vpop.f32.mrb[7].mxu0 }
 0x144   : > { %646 = vmax.xlane.f32.xlu1 %v1888_v39  ;;  %648 = vmax.xlane.f32.xlu0 %v1896_v42 }
 0x148   : > { %650 = vmax.xlane.f32.xlu1 %v1894_v41 }
 0x1c5   : > { %v637_v57 = vpop.xlane.xlu0 %636 }
 0x1c6   : > { %v652_v58 = vmax.f32 %v628_v56, %v637_v57 }
 0x1c8   : > { %v660_v61 = vsub.f32 %v628_v56, %v652_v58  ;;  %975 = vst.msk [vmem:[#allocation2] sm:$0xff] %vm788_vm4, %v652_v58  ;;  %686 = vperm.xlu0 %1567, %v652_v58  }
 0x1c9   : > { %v639_v62 = vpop.xlane.xlu0 %638  ;;  %v641_v63 = vpop.xlane.xlu1 %640 }
 0x1ca   : > { %v668_v2 = vmul.f32 1.442695, %v660_v61  ;;  %v653_v3 = vmax.f32 %v1909_v59, %v639_v62  ;;  %v654_v4 = vmax.f32 %v1911_v60, %v641_v63 }
 0x1cc   : > { %1569 = vpow2.f32 %v668_v2  ;;  %976 = vst.msk [vmem:[#allocation2 + $0x8] sm:$0xff] %vm788_vm4, %v653_v3  ;;  %977 = vst.msk [vmem:[#allocation2 + $0x10] sm:$0xff] %vm788_vm4, %v654_v4  ;;  %691 = vperm.xlu1 %1568, %v653_v3   ;;  %v661_v29 = vsub.f32 %v1909_v59, %v653_v3  ;;  %v662_v47 = vsub.f32 %v1911_v60, %v654_v4 }
 0x1cd   : > { %v643_v8 = vpop.xlane.xlu1 %642  ;;  %v645_v9 = vpop.xlane.xlu0 %644 }
 0x1ce   : > { %v655_v12 = vmax.f32 %v631_v6, %v643_v8  ;;  %v656_v13 = vmax.f32 %v1918_v7, %v645_v9  ;;  %v670_v46 = vmul.f32 1.442695, %v661_v29  ;;  %v672_v48 = vmul.f32 1.442695, %v662_v47  ;;  %v748_v29 = vld [vmem:[#allocation3] sm:$0xff] }
 0x1d0   : > { %v663_v17 = vsub.f32 %v631_v6, %v655_v12  ;;  %978 = vst.msk [vmem:[#allocation2 + $0x18] sm:$0xff] %vm788_vm4, %v655_v12  ;;  %701 = vperm.xlu1 %1568, %v655_v12   ;;  %979 = vst.msk [vmem:[#allocation2 + $0x20] sm:$0xff] %vm788_vm4, %v656_v13  ;;  %v664_v49 = vsub.f32 %v1918_v7, %v656_v13 }
 0x1d1   : > { %v647_v18 = vpop.xlane.xlu1 %646  ;;  %v649_v19 = vpop.xlane.xlu0 %648 }
 0x1d2   : > { %v674_v22 = vmul.f32 1.442695, %v663_v17  ;;  %v657_v23 = vmax.f32 %v633_v14, %v647_v18  ;;  %v1932_v24 = vmax.f32 %v1925_v15, %v649_v19  ;;  %v676_v51 = vmul.f32 1.442695, %v664_v49  ;;  %v753_v49 = vld [vmem:[#allocation3 + $0x28] sm:$0xff] }
 0x1d4   : > { %1571 = vpow2.f32 %v674_v22  ;;  %v665_v27 = vsub.f32 %v633_v14, %v657_v23  ;;  %980 = vst.msk [vmem:[#allocation2 + $0x28] sm:$0xff] %vm788_vm4, %v657_v23  ;;  %696 = vperm.xlu1 %1568, %v654_v4   ;;  %v666_v28 = vsub.f32 %v1925_v15, %v1932_v24  ;;  %981 = vst.msk [vmem:[#allocation2 + $0x30] sm:$0xff] %vm788_vm4, %v1932_v24 }
 0x1d5   : > { %v651_v30 = vpop.xlane.xlu1 %650 }
 0x1d6   : > { %v1944_v33 = vpop.eup %1569  ;;  %v678_v34 = vmul.f32 1.442695, %v665_v27  ;;  %v1947_v43 = vmax.f32 %v1934_v25, %v651_v30  ;;  %v680_v18 = vmul.f32 1.442695, %v666_v28  ;;  %v749_v30 = vld [vmem:[#allocation3 + $0x8] sm:$0xff] }
 0x1d7   : > { %807 = vperm.xlu0 %1567, %v1944_v33   ;;  %v756_v15 = vmul.f32 %v1944_v33, %v748_v29 }
 0x1d8   : > { %1573 = vpow2.f32 %v678_v34  ;;  %711 = vperm.xlu1 %1568, %v657_v23   ;;  %v667_v45 = vsub.f32 %v1934_v25, %v1947_v43  ;;  %982 = vst.msk [vmem:[#allocation2 + $0x38] sm:$0xff] %vm788_vm4, %v1947_v43  ;;  %v751_v34 = vld [vmem:[#allocation3 + $0x18] sm:$0xff] }
 0x1d9   : > { %1575 = vpow2.f32 %v670_v46  ;;  %v750_v46 = vld [vmem:[#allocation3 + $0x10] sm:$0xff] }
 0x1da   : > { %1577 = vpow2.f32 %v672_v48 }
 0x1db   : > { %1579 = vpow2.f32 %v676_v51 }
 0x1dc   : > { %706 = vperm.xlu1 %1568, %v656_v13  }
 0x1de   : > { %v1956_v50 = vpop.eup %1571 }
 0x1df   : > { %822 = vperm.xlu0 %1567, %v1956_v50   ;;  %v759_v44 = vmul.f32 %v1956_v50, %v751_v34 }
 0x1e0   : > { %716 = vperm.xlu1 %1568, %v1932_v24  }
 0x1e2   : > { %v1960_v52 = vpop.eup %1573 }
 0x1e3   : > { %832 = vperm.xlu0 %1567, %v1960_v52   ;;  %v1964_v53 = vpop.eup %1575 }
 0x1e4   : > { %721 = vperm.xlu1 %1568, %v1947_v43   ;;  %v1967_v54 = vpop.eup %1577  ;;  %v757_v31 = vmul.f32 %v1964_v53, %v749_v30 }
 0x1e5   : > { %v1970_v55 = vpop.eup %1579  ;;  %v758_v33 = vmul.f32 %v1967_v54, %v750_v46  ;;  %v1004_v46 = vstv (!%p1288_p10), %s1003_s30 }
 0x1e8   : > { %812 = vperm.xlu1 %1568, %v1964_v53   ;;  %v761_v53 = vmul.f32 %v1960_v52, %v753_v49 }
 0x1ec   : > { %817 = vperm.xlu1 %1568, %v1967_v54  }
 0x1f0   : > { %827 = vperm.xlu1 %1568, %v1970_v55  }
 0x247   : > { %v687_v56 = vpop.permute.xlu0 %686 }
 0x248   : > { %v724_v57 = vsub.f32 %v1879_v36, %v687_v56 }
 0x24a   : > { %v732_v58 = vmul.f32 1.442695, %v724_v57  ;;  %v752_v57 = vld [vmem:[#allocation3 + $0x20] sm:$0xff] }
 0x24b   : > { %v692_v59 = vpop.permute.xlu1 %691  ;;  %v760_v50 = vmul.f32 %v1970_v55, %v752_v57 }
 0x24c   : > { %1581 = vpow2.f32 %v732_v58  ;;  %v725_v60 = vsub.f32 %v1877_v35, %v692_v59 }
 0x24e   : > { %v734_v61 = vmul.f32 1.442695, %v725_v60  ;;  %v754_v60 = vld [vmem:[#allocation3 + $0x30] sm:$0xff] }
 0x24f   : > { %v702_v62 = vpop.permute.xlu1 %701 }
 0x250   : > { %1583 = vpow2.f32 %v734_v61  ;;  %v727_v63 = vsub.f32 %v1882_v37, %v702_v62 }
 0x252   : > { %v738_v0 = vmul.f32 1.442695, %v727_v63  ;;  %v755_v63 = vld [vmem:[#allocation3 + $0x38] sm:$0xff] }
 0x253   : > { %v697_v1 = vpop.permute.xlu1 %696 }
 0x254   : > { %1585 = vpow2.f32 %v738_v0  ;;  %v726_v2 = vsub.f32 %v1884_v38, %v697_v1 }
 0x256   : > { %v1582_v3 = vpop.eup %1581  ;;  %v736_v4 = vmul.f32 1.442695, %v726_v2  ;;  %v808_v22 = vpop.permute.xlu0 %807 }
 0x257   : > { %v712_v5 = vpop.permute.xlu1 %711  ;;  %764 = vadd.xlane.f32.xlu1 %v1582_v3  ;;  %1415 = vmatprep.mubr.f32.mxu1 %v1582_v3  ;;  %v798_v3 = vld [vmem:[#allocation4 + $0x8] sm:$0xff] }
 0x258   : > { %1587 = vpow2.f32 %v736_v4  ;;  %v729_v36 = vsub.f32 %v1888_v39, %v712_v5  ;;  %v797_v4 = vld [vmem:[#allocation4] sm:$0xff] }
 0x259   : > { %v845_v55 = vmul.f32 %v808_v22, %v797_v4  ;;  %v1069_v4 = vld [vmem:[%s1765_s14] sm:$0xff] (!%p1288_p10) }
 0x25a   : > { %v1584_v6 = vpop.eup %1583  ;;  %v742_v35 = vmul.f32 1.442695, %v729_v36 }
 0x25b   : > { %v707_v7 = vpop.permute.xlu1 %706  ;;  %766 = vadd.xlane.f32.xlu0 %v1584_v6  ;;  %1416 = vmatmul.mubr.f32.vlgmr.msra.gmra.mrb[0].mxu1 %v1584_v6 }
 0x25c   : > { %1589 = vpow2.f32 %v742_v35  ;;  %v728_v37 = vsub.f32 %v1890_v40, %v707_v7 }
 0x25e   : > { %v1586_v8 = vpop.eup %1585  ;;  %v740_v9 = vmul.f32 1.442695, %v728_v37  ;;  %v823_v26 = vpop.permute.xlu0 %822  ;;  %v800_v37 = vld [vmem:[#allocation4 + $0x18] sm:$0xff] }
 0x25f   : > { %v717_v10 = vpop.permute.xlu1 %716  ;;  %770 = vadd.xlane.f32.xlu1 %v1586_v8 }
 0x260   : > { %1591 = vpow2.f32 %v740_v9  ;;  %v730_v38 = vsub.f32 %v1896_v42, %v717_v10  ;;  %v848_v9 = vmul.f32 %v823_v26, %v800_v37  ;;  %v1072_v37 = vld [vmem:[%s1765_s14 + $0x18] sm:$0xff] (!%p1288_p10) }
 0x262   : > { %v1588_v11 = vpop.eup %1587  ;;  %v744_v12 = vmul.f32 1.442695, %v730_v38  ;;  %v833_v24 = vpop.permute.xlu0 %832 }
 0x263   : > { %768 = vadd.xlane.f32.xlu0 %v1588_v11  ;;  %v722_v13 = vpop.permute.xlu1 %721  ;;  %1418 = vmatprep.mubr.f32.mxu1 %v1588_v11 }
 0x264   : > { %1593 = vpow2.f32 %v744_v12  ;;  %v731_v39 = vsub.f32 %v1894_v41, %v722_v13  ;;  %1419 = vmatmul.mubr.f32.gmra.mrb[2].mxu1 %v1586_v8  ;;  %v682_v41 = vmul.f32 1.442695, %v667_v45  ;;  %v799_v8 = vld [vmem:[#allocation4 + $0x10] sm:$0xff] }
 0x266   : > { %v1590_v14 = vpop.eup %1589  ;;  %v746_v16 = vmul.f32 1.442695, %v731_v39  ;;  %v802_v39 = vld [vmem:[#allocation4 + $0x28] sm:$0xff] }
 0x267   : > { %774 = vadd.xlane.f32.xlu1 %v1590_v14  ;;  %v813_v21 = vpop.permute.xlu1 %812 }
 0x268   : > { %1595 = vpow2.f32 %v746_v16  ;;  %v846_v5 = vmul.f32 %v813_v21, %v798_v3  ;;  %v850_v16 = vmul.f32 %v833_v24, %v802_v39  ;;  %v803_v21 = vld [vmem:[#allocation4 + $0x30] sm:$0xff] }
 0x269   : > { %1597 = vpow2.f32 %v680_v18 }
 0x26a   : > { %v1592_v40 = vpop.eup %1591  ;;  %1599 = vpow2.f32 %v682_v41 }
 0x26b   : > { %772 = vadd.xlane.f32.xlu0 %v1592_v40  ;;  %1421 = vmatprep.mubr.f32.mxu1 %v1592_v40  ;;  %v818_v23 = vpop.permute.xlu1 %817 }
 0x26c   : > { %1422 = vmatmul.mubr.f32.gmra.mrb[4].mxu1 %v1590_v14  ;;  %v847_v10 = vmul.f32 %v818_v23, %v799_v8  ;;  %v801_v14 = vld [vmem:[#allocation4 + $0x20] sm:$0xff] }
 0x26e   : > { %v1594_v17 = vpop.eup %1593 }
 0x26f   : > { %776 = vadd.xlane.f32.xlu0 %v1594_v17  ;;  %1424 = vmatprep.mubr.f32.mxu1 %v1594_v17  ;;  %v1987_v27 = vpop.permute.xlu1 %827 }
 0x270   : > { %v849_v40 = vmul.f32 %v1987_v27, %v801_v14 }
 0x272   : > { %v1596_v42 = vpop.eup %1595 }
 0x273   : > { %778 = vadd.xlane.f32.xlu1 %v1596_v42  ;;  %1425 = vmatmul.mubr.f32.gmra.mrb[6].mxu1 %v1596_v42  ;;  %v1598_v19 = vpop.eup %1597 }
 0x274   : > { %v1600_v20 = vpop.eup %1599  ;;  %v762_v54 = vmul.f32 %v1598_v19, %v754_v60 }
 0x275   : > { %v763_v1 = vmul.f32 %v1600_v20, %v755_v63 }
 0x284   : > { %837 = vperm.xlu1 %1568, %v1598_v19   ;;  %v804_v19 = vld [vmem:[#allocation4 + $0x38] sm:$0xff] }
 0x285   : > { %842 = vperm.xlu0 %1567, %v1600_v20  }
 0x2e4   : > { %v765_v28 = vpop.xlane.xlu1 %764 }
 0x2e5   : > { %v780_v25 = vadd.f32 %v765_v28, %v756_v15 }
 0x2e7   : > { %789 = vst.msk [vmem:[#allocation3] sm:$0xff] %vm788_vm4, %v780_v25 }
 0x2e8   : > { %v767_v32 = vpop.xlane.xlu0 %766 }
 0x2e9   : > { %v781_v43 = vadd.f32 %v767_v32, %v757_v31  ;;  %v1678_v31 = vmov (!%p1288_p10), 0  }
 0x2ea   : > { %1602 = vset.pattern.permute.xlu1 (!%p1288_p10), %v1678_v31  ;;  %1601 = vset.pattern.permute.xlu0 (!%p1288_p10), %v1678_v31 }
 0x2eb   : > { %790 = vst.msk [vmem:[#allocation3 + $0x8] sm:$0xff] %vm788_vm4, %v781_v43 }
 0x2ec   : > { %v771_v45 = vpop.xlane.xlu1 %770 }
 0x2ed   : > { %v783_v47 = vadd.f32 %v771_v45, %v759_v44 }
 0x2ee   : > { %v987_v30 = vld [vmem:[#allocation3] sm:$0xff] (!%p1288_p10) }
 0x2ef   : > { %792 = vst.msk [vmem:[#allocation3 + $0x18] sm:$0xff] %vm788_vm4, %v783_v47 }
 0x2f0   : > { %v769_v48 = vpop.xlane.xlu0 %768 }
 0x2f1   : > { %v782_v51 = vadd.f32 %v769_v48, %v758_v33 }
 0x2f2   : > { %v988_v32 = vld [vmem:[#allocation3 + $0x8] sm:$0xff] (!%p1288_p10) }
 0x2f3   : > { %791 = vst.msk [vmem:[#allocation3 + $0x10] sm:$0xff] %vm788_vm4, %v782_v51 }
 0x2f4   : > { %v775_v56 = vpop.xlane.xlu1 %774 }
 0x2f5   : > { %v785_v58 = vadd.f32 %v775_v56, %v761_v53 }
 0x2f6   : > { %v990_v25 = vld [vmem:[#allocation3 + $0x18] sm:$0xff] (!%p1288_p10) }
 0x2f7   : > { %794 = vst.msk [vmem:[#allocation3 + $0x28] sm:$0xff] %vm788_vm4, %v785_v58 }
 0x2f8   : > { %v773_v59 = vpop.xlane.xlu0 %772 }
 0x2f9   : > { %v784_v61 = vadd.f32 %v773_v59, %v760_v50 }
 0x2fa   : > { %v989_v27 = vld [vmem:[#allocation3 + $0x10] sm:$0xff] (!%p1288_p10) }
 0x2fb   : > { %793 = vst.msk [vmem:[#allocation3 + $0x20] sm:$0xff] %vm788_vm4, %v784_v61  ;;  %1603 = vrcp.f32 (!%p1288_p10), %v989_v27 }
 0x2fc   : > { %v777_v62 = vpop.xlane.xlu0 %776  ;;  %1605 = vrcp.f32 (!%p1288_p10), %v987_v30 }
 0x2fd   : > { %v786_v0 = vadd.f32 %v777_v62, %v762_v54  ;;  %1607 = vrcp.f32 (!%p1288_p10), %v990_v25 }
 0x2fe   : > { %v992_v34 = vld [vmem:[#allocation3 + $0x28] sm:$0xff] (!%p1288_p10)  ;;  %1609 = vrcp.f32 (!%p1288_p10), %v988_v32 }
 0x2ff   : > { %795 = vst.msk [vmem:[#allocation3 + $0x30] sm:$0xff] %vm788_vm4, %v786_v0  ;;  %1611 = vrcp.f32 (!%p1288_p10), %v992_v34 }
 0x300   : > { %v779_v52 = vpop.xlane.xlu1 %778 }
 0x301   : > { %v787_v2 = vadd.f32 %v779_v52, %v763_v1  ;;  %v1071_v52 = vld [vmem:[%s1765_s14 + $0x10] sm:$0xff] (!%p1288_p10) }
 0x302   : > { %v991_v43 = vld [vmem:[#allocation3 + $0x20] sm:$0xff] (!%p1288_p10) }
 0x303   : > { %796 = vst.msk [vmem:[#allocation3 + $0x38] sm:$0xff] %vm788_vm4, %v787_v2  ;;  %1613 = vrcp.f32 (!%p1288_p10), %v991_v43 }
 0x304   : > { %v843_v20 = vpop.permute.xlu0 %842  ;;  %v838_v22 = vpop.permute.xlu1 %837 }
 0x305   : > { %v852_v23 = vmul.f32 %v843_v20, %v804_v19  ;;  %v851_v26 = vmul.f32 %v838_v22, %v803_v21  ;;  %v1604_v47 = vpop.eup (!%p1288_p10), %1603 }
 0x306   : > { %v993_v45 = vld [vmem:[#allocation3 + $0x30] sm:$0xff] (!%p1288_p10)  ;;  %v1606_v33 = vpop.eup (!%p1288_p10), %1605  ;;  %v1007_v48 = vmul.f32 (!%p1288_p10), %v1604_v47, %v1004_v46 }
 0x307   : > { %v1608_v49 = vpop.eup (!%p1288_p10), %1607  ;;  %v1005_v51 = vmul.f32 (!%p1288_p10), %v1606_v33, %v1004_v46 }
 0x308   : > { %v1610_v53 = vpop.eup (!%p1288_p10), %1609  ;;  %1033 = vperm.xlu1 (!%p1288_p10), %1602, %v1007_v48   ;;  %v1008_v56 = vmul.f32 (!%p1288_p10), %v1608_v49, %v1004_v46 }
 0x309   : > { %v1612_v57 = vpop.eup (!%p1288_p10), %1611  ;;  %1023 = vperm.xlu0 (!%p1288_p10), %1601, %v1005_v51   ;;  %v1006_v58 = vmul.f32 (!%p1288_p10), %v1610_v53, %v1004_v46 }
 0x30a   : > { %v994_v44 = vld [vmem:[#allocation3 + $0x38] sm:$0xff] (!%p1288_p10)  ;;  %v1010_v59 = vmul.f32 (!%p1288_p10), %v1612_v57, %v1004_v46 }
 0x30b   : > { %1615 = vrcp.f32 (!%p1288_p10), %v994_v44 }
 0x30c   : > { %1617 = vrcp.f32 (!%p1288_p10), %v993_v45  ;;  %1038 = vperm.xlu1 (!%p1288_p10), %1602, %v1008_v56  }
 0x30d   : > { %v1614_v50 = vpop.eup (!%p1288_p10), %1613  ;;  %1028 = vperm.xlu0 (!%p1288_p10), %1601, %v1006_v58  }
 0x30e   : > { %v1009_v61 = vmul.f32 (!%p1288_p10), %v1614_v50, %v1004_v46 }
 0x310   : > { %1048 = vperm.xlu1 (!%p1288_p10), %1602, %v1010_v59  }
 0x311   : > { %1043 = vperm.xlu0 (!%p1288_p10), %1601, %v1009_v61  }
 0x315   : > { %v1616_v60 = vpop.eup (!%p1288_p10), %1615 }
 0x316   : > { %v1618_v54 = vpop.eup (!%p1288_p10), %1617  ;;  %v1012_v62 = vmul.f32 (!%p1288_p10), %v1616_v60, %v1004_v46 }
 0x317   : > { %v1011_v63 = vmul.f32 (!%p1288_p10), %v1618_v54, %v1004_v46 }
 0x318   : > { %1058 = vperm.xlu1 (!%p1288_p10), %1602, %v1012_v62  }
 0x319   : > { %1053 = vperm.xlu0 (!%p1288_p10), %1601, %v1011_v63  }
 0x32e   : > { %v1417_v36 = vpop.f32.mrb[0].mxu1 }
 0x32f   : > { %v959_v6 = vadd.f32 %v1417_v36, %v846_v5  ;;  %v919_v35 = vpop.f32.mrb[1].mxu1 }
 0x330   : > { %v958_v7 = vadd.f32 %v919_v35, %v845_v55 }
 0x331   : > { %968 = vst.msk [vmem:[#allocation4 + $0x8] sm:$0xff] %vm966_vm5, %v959_v6 }
 0x332   : > { %967 = vst.msk [vmem:[#allocation4] sm:$0xff] %vm966_vm5, %v958_v7 }
 0x337   : > { %v1420_v38 = vpop.f32.mrb[2].mxu1 }
 0x338   : > { %v961_v11 = vadd.f32 %v1420_v38, %v848_v9  ;;  %v929_v12 = vpop.f32.mrb[3].mxu1  ;;  %v1014_v35 = vld [vmem:[#allocation4 + $0x8] sm:$0xff] (!%p1288_p10) }
 0x339   : > { %v960_v13 = vadd.f32 %v929_v12, %v847_v10  ;;  %v1013_v1 = vld [vmem:[#allocation4] sm:$0xff] (!%p1288_p10)  ;;  %v1070_v10 = vld [vmem:[%s1765_s14 + $0x8] sm:$0xff] (!%p1288_p10) }
 0x33a   : > { %970 = vst.msk [vmem:[#allocation4 + $0x18] sm:$0xff] %vm966_vm5, %v961_v11 }
 0x33b   : > { %969 = vst.msk [vmem:[#allocation4 + $0x10] sm:$0xff] %vm966_vm5, %v960_v13 }
 0x33f   : > { %v1423_v17 = vpop.f32.mrb[4].mxu1 }
 0x340   : > { %v963_v42 = vadd.f32 %v1423_v17, %v850_v16  ;;  %v939_v18 = vpop.f32.mrb[5].mxu1  ;;  %v1074_v16 = vld [vmem:[%s1765_s14 + $0x28] sm:$0xff] (!%p1288_p10) }
 0x341   : > { %v962_v41 = vadd.f32 %v939_v18, %v849_v40  ;;  %v1016_v36 = vld [vmem:[#allocation4 + $0x18] sm:$0xff] (!%p1288_p10) }
 0x342   : > { %972 = vst.msk [vmem:[#allocation4 + $0x28] sm:$0xff] %vm966_vm5, %v963_v42  ;;  %v1015_v0 = vld [vmem:[#allocation4 + $0x10] sm:$0xff] (!%p1288_p10)  ;;  %v1073_v42 = vld [vmem:[%s1765_s14 + $0x20] sm:$0xff] (!%p1288_p10) }
 0x343   : > { %971 = vst.msk [vmem:[#allocation4 + $0x20] sm:$0xff] %vm966_vm5, %v962_v41 }
 0x344   : > { %986 = sbr.rel (%p1288_p10) target bundleno = 926 (0x39e), region = 48 }
 0x346   : > { %v1426_v29 = vpop.f32.mrb[6].mxu1 }
 0x347   : > { %v965_v15 = vadd.f32 %v1426_v29, %v852_v23  ;;  %v949_v28 = vpop.f32.mrb[7].mxu1  ;;  %v1076_v23 = vld [vmem:[%s1765_s14 + $0x38] sm:$0xff] (!%p1288_p10) }
 0x348   : > { %v964_v24 = vadd.f32 %v949_v28, %v851_v26 }
 0x349   : > { %974 = vst.msk [vmem:[#allocation4 + $0x38] sm:$0xff] %vm966_vm5, %v965_v15  ;;  %v1018_v12 = vld [vmem:[#allocation4 + $0x28] sm:$0xff] (!%p1288_p10)  ;;  %v1075_v15 = vld [vmem:[%s1765_s14 + $0x30] sm:$0xff] (!%p1288_p10) }
 0x34a   : > { %973 = vst.msk [vmem:[#allocation4 + $0x30] sm:$0xff] %vm966_vm5, %v964_v24  ;;  %v1017_v39 = vld [vmem:[#allocation4 + $0x20] sm:$0xff] (!%p1288_p10) }
 0x350   : > { %v1020_v19 = vld [vmem:[#allocation4 + $0x38] sm:$0xff] }
 0x351   : > { %v1019_v21 = vld [vmem:[#allocation4 + $0x30] sm:$0xff] }
 0x387   : > { %v1034_v2 = vpop.permute.xlu1 %1033 }
 0x388   : > { %v1063_v3 = vmul.f32 %v1034_v2, %v1015_v0  ;;  %v1024_v5 = vpop.permute.xlu0 %1023 }
 0x389   : > { %v1061_v55 = vmul.f32 %v1024_v5, %v1013_v1 }
 0x38a   : > { %v1079_v6 = vadd.f32 %v1071_v52, %v1063_v3 }
 0x38b   : > { %v1077_v7 = vadd.f32 %v1069_v4, %v1061_v55  ;;  %v1039_v8 = vpop.permute.xlu1 %1038 }
 0x38c   : > { %1087 = vst.msk [vmem:[%s1770_s17 + $0x10] sm:$0xff] %vm966_vm5, %v1079_v6  ;;  %v1064_v9 = vmul.f32 %v1039_v8, %v1016_v36  ;;  %v1029_v38 = vpop.permute.xlu0 %1028 }
 0x38d   : > { %1085 = vst.msk [vmem:[%s1770_s17] sm:$0xff] %vm966_vm5, %v1077_v7  ;;  %v1062_v11 = vmul.f32 %v1029_v38, %v1014_v35 }
 0x38e   : > { %v1080_v13 = vadd.f32 %v1072_v37, %v1064_v9 }
 0x38f   : > { %v1078_v14 = vadd.f32 %v1070_v10, %v1062_v11  ;;  %v1049_v40 = vpop.permute.xlu1 %1048 }
 0x390   : > { %1088 = vst.msk [vmem:[%s1770_s17 + $0x18] sm:$0xff] %vm966_vm5, %v1080_v13  ;;  %v1066_v17 = vmul.f32 %v1049_v40, %v1018_v12  ;;  %v1044_v18 = vpop.permute.xlu0 %1043 }
 0x391   : > { %1086 = vst.msk [vmem:[%s1770_s17 + $0x8] sm:$0xff] %vm966_vm5, %v1078_v14  ;;  %v1065_v41 = vmul.f32 %v1044_v18, %v1017_v39 }
 0x392   : > { %v1082_v20 = vadd.f32 %v1074_v16, %v1066_v17 }
 0x393   : > { %v1081_v22 = vadd.f32 %v1073_v42, %v1065_v41 }
 0x394   : > { %1090 = vst.msk [vmem:[%s1770_s17 + $0x28] sm:$0xff] %vm966_vm5, %v1082_v20 }
 0x395   : > { %1089 = vst.msk [vmem:[%s1770_s17 + $0x20] sm:$0xff] %vm966_vm5, %v1081_v22 }
 0x397   : > { %v1059_v26 = vpop.permute.xlu1 %1058 }
 0x398   : > { %v1068_v29 = vmul.f32 %v1059_v26, %v1020_v19  ;;  %v1054_v28 = vpop.permute.xlu0 %1053 }
 0x399   : > { %v1067_v24 = vmul.f32 %v1054_v28, %v1019_v21 }
 0x39a   : > { %v1084_v27 = vadd.f32 %v1076_v23, %v1068_v29 }
 0x39b   : > { %v1083_v30 = vadd.f32 %v1075_v15, %v1067_v24 }
 0x39c   : > { %1092 = vst.msk [vmem:[%s1770_s17 + $0x38] sm:$0xff] %vm966_vm5, %v1084_v27 }
 0x39d   : > { %1091 = vst.msk [vmem:[%s1770_s17 + $0x30] sm:$0xff] %vm966_vm5, %v1083_v30 }
 0x39e PF: > { %s16_s26 = sadd.s32 1, %s1673_s26   ;;  %s2066_s20 = smov %s1661_s23 }
 0x39f   : > { %p13_p11 = scmp.ge.s32.totalorder %s16_s26, 18   ;;  %s2067_s21 = smov %s1665_s24 }
 0x3a0   : > { %s2068_s22 = smov %s1669_s25  ;;  %s2069_s23 = smov %s2073_s4 }
 0x3a1   : > { %s2070_s24 = smov %s2077_s27  ;;  %s2071_s25 = smov %s2081_s28 }
 0x3a2   :  { %15 = sbr.rel (!%p13_p11) target bundleno = 4 (0x4), region = 87 }

</bundles_post_ra>
